<compile_context>
chip_gen: v5e
topology: v5e:2x2
jax: 0.10.0
libtpu: 0.0.40
codegen_flags: <defaults>
</compile_context>

<pallas_src>
import jax
import jax.numpy as jnp
from jax.experimental import pallas as pl
from jax.experimental.pallas import tpu as pltpu


def _neuralnet_kernel(x_ref, w1_ref, b1_ref, w2_ref, b2_ref, o_ref):
    # x: (TB, D), w1: (D, H) [gate pre-folded], b1: (1, H), w2: (H, C), b2: (1, C)
    x = x_ref[...]

    # fc1 (+ folded CancelOut gate) + ReLU6. Cast activations to the weight dtype:
    # no-op for f32 weights, bf16 MXU path if bf16 weights were supplied; accumulation f32.
    h = jnp.dot(x.astype(w1_ref.dtype), w1_ref[...],
                preferred_element_type=jnp.float32) + b1_ref[...]
    h = jnp.clip(h, 0.0, 6.0)                                        # nn.ReLU6

    # fc2 — output block last dim equals the full classes dim (no lane padding).
    out = jnp.dot(h.astype(w2_ref.dtype), w2_ref[...],
                  preferred_element_type=jnp.float32) + b2_ref[...]
    o_ref[...] = out.astype(o_ref.dtype)


def neuralnet_forward(x, cancelout_w, w1, b1, w2, b2, *,
                      batch_tile=4096, use_bf16_weights=False):
    """x: (B, D). Returns (B, num_classes) float32.

    w1: (D, H) pre-transposed fc1 weight, b1: (H,)
    w2: (H, C) pre-transposed fc2 weight, b2: (C,)
    """
    B, D = x.shape
    H = w1.shape[1]
    C = w2.shape[1]

    # ---- parameter prep (one-time, parameter-sized; not batch-sized data) ----
    # Fold the CancelOut gate into fc1: (x * sigmoid(cw)) @ w1 == x @ (sigmoid(cw)[:,None]*w1)
    gate = jax.nn.sigmoid(cancelout_w.astype(jnp.float32))            # (D,)
    w1_eff = gate[:, None] * w1.astype(jnp.float32)                   # (D, H)
    w2_eff = w2.astype(jnp.float32)

    if use_bf16_weights:
        # bf16-native MXU on v5e/v6e/v7x; biases stay f32, accumulation stays f32.
        w1_eff = w1_eff.astype(jnp.bfloat16)
        w2_eff = w2_eff.astype(jnp.bfloat16)

    b1_2 = b1.reshape(1, H).astype(jnp.float32)
    b2_2 = b2.reshape(1, C).astype(jnp.float32)

    cost = pl.CostEstimate(
        flops=2 * B * (D * H + H * C),
        transcendentals=0,                                  # sigmoid folded into wrapper
        bytes_accessed=(x.nbytes + w1_eff.nbytes + b1_2.nbytes
                        + w2_eff.nbytes + b2_2.nbytes + B * C * 4),
    )

    if B <= batch_tile:
        # Tiny problem: everything fits in VMEM many times over. Skip the grid /
        # pipelining machinery entirely -- single kernel invocation, whole-array refs.
        return pl.pallas_call(
            _neuralnet_kernel,
            out_shape=jax.ShapeDtypeStruct((B, C), jnp.float32),
            in_specs=[pl.BlockSpec(memory_space=pltpu.MemorySpace.VMEM)] * 5,
            out_specs=pl.BlockSpec(memory_space=pltpu.MemorySpace.VMEM),
            cost_estimate=cost,
        )(x, w1_eff, b1_2, w2_eff, b2_2)

    # Realistic batch: stream only the activations; weights/biases get a constant
    # index_map so they are DMA'd once and stay VMEM-resident across grid steps.
    # Batch axis is "parallel" -> v7x's 2 TensorCores each take half the tiles.
    # No wrapper-side padding: Pallas handles the boundary block when B % TB != 0
    # (padded input rows compute garbage that is never written back).
    tb = max(8, ((batch_tile + 7) // 8) * 8)                # sublane-aligned tile
    nb = pl.cdiv(B, tb)

    return pl.pallas_call(
        _neuralnet_kernel,
        out_shape=jax.ShapeDtypeStruct((B, C), jnp.float32),
        grid=(nb,),
        in_specs=[
            pl.BlockSpec((tb, D), lambda i: (i, 0)),        # x   (streams)
            pl.BlockSpec((D, H), lambda i: (0, 0)),         # w1  (resident, gate folded)
            pl.BlockSpec((1, H), lambda i: (0, 0)),         # b1  (resident)
            pl.BlockSpec((H, C), lambda i: (0, 0)),         # w2  (resident)
            pl.BlockSpec((1, C), lambda i: (0, 0)),         # b2  (resident)
        ],
        out_specs=pl.BlockSpec((tb, C), lambda i: (i, 0)),
        compiler_params=pltpu.CompilerParams(
            dimension_semantics=("parallel",)),
        cost_estimate=cost,
    )(x, w1_eff, b1_2, w2_eff, b2_2)


def reference_forward(x, cancelout_w, w1, b1, w2, b2):
    x1 = x * jax.nn.sigmoid(cancelout_w)
    h = jnp.clip(x1 @ w1 + b1, 0.0, 6.0)
    return h @ w2 + b2


if __name__ == "__main__":
    # Shapes consistent with the module: NeuralNet(input_size=16, hidden=32, classes=4)
    batch, input_size, hidden_size, num_classes = 8, 16, 32, 4

    key = jax.random.PRNGKey(0)
    kx, kx2, k1, kb1, k2, kb2 = jax.random.split(key, 6)

    x = jax.random.normal(kx, (batch, input_size), dtype=jnp.float32)

    # CancelOut layer: nn.Parameter(torch.zeros(input_size))
    cancelout_w = jnp.zeros((input_size,), dtype=jnp.float32)

    # Deterministic init mimicking nn.Linear's uniform(-1/sqrt(fan_in), 1/sqrt(fan_in)).
    lim1 = 1.0 / (input_size ** 0.5)
    w1 = jax.random.uniform(k1, (input_size, hidden_size), jnp.float32, -lim1, lim1)
    b1 = jax.random.uniform(kb1, (hidden_size,), jnp.float32, -lim1, lim1)

    lim2 = 1.0 / (hidden_size ** 0.5)
    w2 = jax.random.uniform(k2, (hidden_size, num_classes), jnp.float32, -lim2, lim2)
    b2 = jax.random.uniform(kb2, (num_classes,), jnp.float32, -lim2, lim2)

    # --- Gridless (small-batch) path ---
    out = neuralnet_forward(x, cancelout_w, w1, b1, w2, b2)
    out = jax.block_until_ready(out)
    ref = reference_forward(x, cancelout_w, w1, b1, w2, b2)
    assert out.shape == (batch, num_classes)
    assert jnp.allclose(out, ref, atol=1e-5, rtol=1e-5), "mismatch vs reference (small path)"

    # --- Batch-tiled path (weights resident, parallel batch axis) ---
    # Exercised with a tiny tile and B not divisible by the tile, so the gridded code path
    # and the Pallas-handled boundary block are both compiled/run and checked here.
    batch2 = 20
    x2 = jax.random.normal(kx2, (batch2, input_size), dtype=jnp.float32)
    out_tiled = neuralnet_forward(x2, cancelout_w, w1, b1, w2, b2, batch_tile=8)
    out_tiled = jax.block_until_ready(out_tiled)
    ref2 = reference_forward(x2, cancelout_w, w1, b1, w2, b2)
    assert out_tiled.shape == (batch2, num_classes)
    assert jnp.allclose(out_tiled, ref2, atol=1e-5, rtol=1e-5), "mismatch vs reference (tiled path)"

    print("KERNEL_OK")
</pallas_src>

<mosaic_0001>
module attributes {stable_mosaic.version = 11 : i64} {
  func.func @_neuralnet_kernel(%arg0: memref<8x16xf32, #tpu.memory_space<vmem>>, %arg1: memref<16x32xf32, #tpu.memory_space<vmem>>, %arg2: memref<1x32xf32, #tpu.memory_space<vmem>>, %arg3: memref<32x4xf32, #tpu.memory_space<vmem>>, %arg4: memref<1x4xf32, #tpu.memory_space<vmem>>, %arg5: memref<8x4xf32, #tpu.memory_space<vmem>>) attributes {dimension_semantics = [], scalar_prefetch = 0 : i64, scratch_operands = 0 : i64, tpu.core_type = #tpu.core_type<tc>} {
    %c0 = arith.constant 0 : index
    %c0_0 = arith.constant 0 : index
    %0 = vector.load %arg0[%c0, %c0_0] : memref<8x16xf32, #tpu.memory_space<vmem>>, vector<8x16xf32>
    %c0_1 = arith.constant 0 : index
    %c0_2 = arith.constant 0 : index
    %1 = vector.load %arg1[%c0_1, %c0_2] : memref<16x32xf32, #tpu.memory_space<vmem>>, vector<16x32xf32>
    %cst = arith.constant dense<0.000000e+00> : vector<8x32xf32>
    %2 = tpu.matmul %0, %1, %cst {dimension_numbers = #tpu.dot_dimension_numbers<[1], [0], [0], [1], [0, 0, 1, 1], [], []>} : vector<8x16xf32>, vector<16x32xf32>, vector<8x32xf32> -> vector<8x32xf32>
    %c0_3 = arith.constant 0 : index
    %c0_4 = arith.constant 0 : index
    %3 = vector.load %arg2[%c0_3, %c0_4] : memref<1x32xf32, #tpu.memory_space<vmem>>, vector<1x32xf32>
    %4 = vector.broadcast %3 : vector<1x32xf32> to vector<8x32xf32>
    %5 = arith.addf %2, %4 : vector<8x32xf32>
    %cst_5 = arith.constant 0.000000e+00 : f32
    %cst_6 = arith.constant 6.000000e+00 : f32
    %6 = vector.broadcast %cst_5 : f32 to vector<8x32xf32>
    %7 = arith.maximumf %6, %5 : vector<8x32xf32>
    %8 = vector.broadcast %cst_6 : f32 to vector<8x32xf32>
    %9 = arith.minimumf %8, %7 : vector<8x32xf32>
    %c0_7 = arith.constant 0 : index
    %c0_8 = arith.constant 0 : index
    %10 = vector.load %arg3[%c0_7, %c0_8] : memref<32x4xf32, #tpu.memory_space<vmem>>, vector<32x4xf32>
    %cst_9 = arith.constant dense<0.000000e+00> : vector<8x4xf32>
    %11 = tpu.matmul %9, %10, %cst_9 {dimension_numbers = #tpu.dot_dimension_numbers<[1], [0], [0], [1], [0, 0, 1, 1], [], []>} : vector<8x32xf32>, vector<32x4xf32>, vector<8x4xf32> -> vector<8x4xf32>
    %c0_10 = arith.constant 0 : index
    %c0_11 = arith.constant 0 : index
    %12 = vector.load %arg4[%c0_10, %c0_11] : memref<1x4xf32, #tpu.memory_space<vmem>>, vector<1x4xf32>
    %13 = vector.broadcast %12 : vector<1x4xf32> to vector<8x4xf32>
    %14 = arith.addf %11, %13 : vector<8x4xf32>
    %c0_12 = arith.constant 0 : index
    %c0_13 = arith.constant 0 : index
    %15 = vector.load %arg5[%c0_12, %c0_13] : memref<8x4xf32, #tpu.memory_space<vmem>>, vector<8x4xf32>
    tpu.vector_store %arg5[%c0_12, %c0_13], %14 {strides = array<i32>} : memref<8x4xf32, #tpu.memory_space<vmem>>, vector<8x4xf32>,
    return
  }
}

</mosaic_0001>

<bundles_post_ra>
// kernel: tpu_custom_call.1
= control target key start
LH: loop header
LB: loop body
LE: loop exit
PB: predicated region body
PF: predicated region fallthrough
CT: control target
= control target key end

     0   :  { %vm27_vm0 = vcmask 130048   ;;  %vm61_vm1 = vcmask 261120   ;;  %vm85_vm2 = vcmask 31744   ;;  %s155_s1 = inlined_call_operand.vmem [shape: f32[16,32], index: 1, kind: input, shape index: {}]   ;;  %s156_s0 = inlined_call_operand.vmem [shape: f32[8,16], index: 0, kind: input, shape index: {}]   ;;  %s157_s2 = inlined_call_operand.vmem [shape: f32[1,32], index: 2, kind: input, shape index: {}]   ;;  %s158_s4 = inlined_call_operand.vmem [shape: f32[1,4], index: 4, kind: input, shape index: {}]   ;;  %s159_s3 = inlined_call_operand.vmem [shape: f32[32,4], index: 3, kind: input, shape index: {}]   ;;  %s160_s5 = inlined_call_operand.vmem [shape: f32[8,4], index: 5, kind: output, shape index: {}]  }
   0x1   :  { %v22_v0 = vld [vmem:[%s155_s1 + $0x8] sm:$0xff]  ;;  %v21_v1 = vld [vmem:[%s155_s1] sm:$0xff]  ;;  %v56_v3 = vld [vmem:[%s159_s3 + $0x18] sm:$0xff] }
   0x2   :  { %45 = vmatpush.msra.mxu0 %v22_v0  ;;  %v20_v2 = vld [vmem:[%s156_s0] sm:$0xff]  ;;  %77 = vmatpush.msra.mxu1 %v56_v3  ;;  %v55_v4 = vld [vmem:[%s159_s3 + $0x10] sm:$0xff]  ;;  %v54_v5 = vld [vmem:[%s159_s3 + $0x8] sm:$0xff] }
   0x3   :  { %v53_v6 = vld [vmem:[%s159_s3] sm:$0xff] }
   0x4   :  { %46 = vmatpush.msra.mxu0 %v21_v1  ;;  %78 = vmatpush.msra.mxu1 %v55_v4  ;;  %v93_v7 = vld [vmem:[%s157_s2] ss:$0 sm:$0xff] }
   0x5   :  { %91 = vmatmul.msk.f32.vlgmr.msra.gmra.mxu0 %vm27_vm0, %v20_v2  ;;  %v94_v12 = vld [vmem:[%s158_s4] ss:$0 sm:$0xff] }
   0x6   :  { %79 = vmatpush.msra.mxu1 %v54_v5 }
   0x8   :  { %80 = vmatpush.msra.mxu1 %v53_v6 }
  0x82   :  { %v48_v8 = vpop.f32.mrf.mxu0 }
  0x83   :  { %v49_v9 = vadd.f32 %v93_v7, %v48_v8 }
  0x85   :  { %v51_v10 = vmax.f32 %v49_v9, 0.0 }
  0x87   :  { %v52_v11 = vmin.f32 %v51_v10, 6.0 }
  0x89   :  { %92 = vmatmul.msk.f32.vlgmr.msra.gmra.mxu1 %vm61_vm1, %v52_v11 }
 0x106   :  { %v82_v13 = vpop.f32.mrf.mxu1 }
 0x107   :  { %v83_v14 = vadd.f32 %v94_v12, %v82_v13 }
 0x109   :  { %86 = vst.msk [vmem:[%s160_s5] sm:$0xff] %vm85_vm2, %v83_v14 }

</bundles_post_ra>
